<compile_context>
chip_gen: v5e
topology: v5e:2x2
jax: 0.10.0
libtpu: 0.0.40
codegen_flags: <defaults>
</compile_context>

<pallas_src>
import functools
import math

import jax
import jax.numpy as jnp
from jax.experimental import pallas as pl
from jax.experimental.pallas import tpu as pltpu

HEAD_PAD = 128       # each head's 113-wide output padded to one lane-dense block
OUT_FEATURES = 113
NUM_HEADS = 3


def _triple_bnn_kernel(H, with_dropout, *refs):
    """Gridless kernel: everything resident in VMEM.

    refs layout:
      with_dropout: x, ws, bs, wa, ba, wb, bb, mask_s, mask_h, y
      else        : x, ws, bs, wa, ba, wb, bb, y
    """
    if with_dropout:
        (x_ref, ws_ref, bs_ref, wa_ref, ba_ref, wb_ref, bb_ref,
         mask_s_ref, mask_h_ref, y_ref) = refs
    else:
        x_ref, ws_ref, bs_ref, wa_ref, ba_ref, wb_ref, bb_ref, y_ref = refs
        mask_s_ref = mask_h_ref = None

    x = x_ref[...]                                   # (B, 3)
    ws = ws_ref[...]                                 # (3, H)

    # Shared layer on the VPU: K=3 contraction as 3 broadcast-FMAs + bias.
    shared = (x[:, 0:1] * ws[0:1, :]
              + x[:, 1:2] * ws[1:2, :]
              + x[:, 2:3] * ws[2:3, :]
              + bs_ref[...])                         # (B, H)
    shared = jnp.maximum(shared, 0.0)
    if mask_s_ref is not None:
        shared = shared * mask_s_ref[...]

    # Three heads, static unrolled loop; each dot is a single MXU pass.
    for i in range(NUM_HEADS):
        h = jnp.dot(shared, wa_ref[i],
                    preferred_element_type=jnp.float32) + ba_ref[i]   # (B, H)
        h = jnp.maximum(h, 0.0)
        if mask_h_ref is not None:
            h = h * mask_h_ref[i]
        y = jnp.dot(h, wb_ref[i],
                    preferred_element_type=jnp.float32) + bb_ref[i]   # (B, 128)
        y_ref[:, i * HEAD_PAD:(i + 1) * HEAD_PAD] = y.astype(y_ref.dtype)


@functools.partial(jax.jit, static_argnames=("dropout_prob",))
def triple_output_bnn(x, params, dropout_key, dropout_prob):
    """Jitted forward; returns (y0, y1, y2), each (B, 113)."""
    B = x.shape[0]
    H = params["ws"].shape[1]
    p = float(dropout_prob)
    with_dropout = p > 0.0

    inputs = [x, params["ws"], params["bs"],
              params["wa"], params["ba"], params["wb"], params["bb"]]

    if with_dropout:
        ks, kh = jax.random.split(dropout_key)
        scale = 1.0 / (1.0 - p)
        mask_s = (jax.random.uniform(ks, (B, H), dtype=jnp.float32) >= p
                  ).astype(jnp.float32) * scale
        mask_h = (jax.random.uniform(kh, (NUM_HEADS, B, H), dtype=jnp.float32) >= p
                  ).astype(jnp.float32) * scale
        inputs += [mask_s, mask_h]

    out_shape = jax.ShapeDtypeStruct((B, NUM_HEADS * HEAD_PAD), jnp.float32)

    in_bytes = sum(int(a.size) * a.dtype.itemsize for a in inputs)
    out_bytes = B * NUM_HEADS * HEAD_PAD * 4
    flops = (2 * B * 3 * H
             + NUM_HEADS * (2 * B * H * H + 2 * B * H * HEAD_PAD))
    vmem_limit = int(min(32 << 20, max(1 << 20, 4 * (in_bytes + out_bytes))))

    vmem = pl.BlockSpec(memory_space=pltpu.MemorySpace.VMEM)
    kernel = functools.partial(_triple_bnn_kernel, H, with_dropout)

    y = pl.pallas_call(
        kernel,
        out_shape=out_shape,
        in_specs=[vmem] * len(inputs),
        out_specs=vmem,
        compiler_params=pltpu.CompilerParams(vmem_limit_bytes=vmem_limit),
        cost_estimate=pl.CostEstimate(flops=flops, transcendentals=0,
                                      bytes_accessed=in_bytes + out_bytes),
    )(*inputs)

    # Single fused slice of the padded lanes; unstacking is free inside jit.
    y = y.reshape(B, NUM_HEADS, HEAD_PAD)[:, :, :OUT_FEATURES]
    return y[:, 0], y[:, 1], y[:, 2]


def _sample_bayes_linear(key, fan_in, fan_out, prior_sigma=0.1):
    """One sampled BayesLinear weight/bias pair (torchbnn-style init).

    W = W_mu + exp(log_sigma) * eps, W_mu ~ U(-1/sqrt(fan_in), 1/sqrt(fan_in)),
    log_sigma initialized to log(prior_sigma).  Weight is (fan_in, fan_out),
    bias is (1, fan_out).
    """
    kmu, kbmu, kwe, kbe = jax.random.split(key, 4)
    bound = 1.0 / math.sqrt(fan_in)
    sigma = prior_sigma
    w_mu = jax.random.uniform(kmu, (fan_in, fan_out), minval=-bound, maxval=bound)
    b_mu = jax.random.uniform(kbmu, (1, fan_out), minval=-bound, maxval=bound)
    w = w_mu + sigma * jax.random.normal(kwe, (fan_in, fan_out))
    b = b_mu + sigma * jax.random.normal(kbe, (1, fan_out))
    return w.astype(jnp.float32), b.astype(jnp.float32)


def make_params(key, no_of_neurones, out_features=OUT_FEATURES):
    """Returns (kernel_params, raw_params).

    kernel_params holds the fused / padded / stacked tensors consumed by the
    Pallas kernel (built once, NOT per forward).  raw_params holds the plain
    per-head sampled weights (used by the pure-JAX reference).
    """
    # TODO(synk): for true MC-BNN behavior, resample eps per forward pass
    # (here weights are sampled once, matching one forward of the torch model).
    H = no_of_neurones
    keys = jax.random.split(key, 7)
    raw = {}
    raw["ws"], raw["bs"] = _sample_bayes_linear(keys[0], 3, H)
    for i in range(NUM_HEADS):
        raw[f"w{i}a"], raw[f"b{i}a"] = _sample_bayes_linear(keys[1 + 2 * i], H, H)
        raw[f"w{i}b"], raw[f"b{i}b"] = _sample_bayes_linear(keys[2 + 2 * i], H, out_features)

    pad_cols = HEAD_PAD - out_features
    params = {
        "ws": raw["ws"],                                            # (3, H)
        "bs": raw["bs"],                                            # (1, H)
        "wa": jnp.stack([raw[f"w{i}a"] for i in range(NUM_HEADS)]),  # (3, H, H)
        "ba": jnp.stack([raw[f"b{i}a"] for i in range(NUM_HEADS)]),  # (3, 1, H)
        "wb": jnp.stack([jnp.pad(raw[f"w{i}b"], ((0, 0), (0, pad_cols)))
                         for i in range(NUM_HEADS)]),                # (3, H, 128)
        "bb": jnp.stack([jnp.pad(raw[f"b{i}b"], ((0, 0), (0, pad_cols)))
                         for i in range(NUM_HEADS)]),                # (3, 1, 128)
    }
    return params, raw


def _reference(x, raw, mask_s, mask_h):
    """Pure-JAX unfused reference using the same sampled weights and masks."""
    shared = jnp.maximum(x @ raw["ws"] + raw["bs"], 0.0) * mask_s
    outs = []
    for i in range(NUM_HEADS):
        h = jnp.maximum(shared @ raw[f"w{i}a"] + raw[f"b{i}a"], 0.0) * mask_h[i]
        outs.append(h @ raw[f"w{i}b"] + raw[f"b{i}b"])
    return tuple(outs)


if __name__ == "__main__":
    NO_OF_NEURONES = 32
    DROPOUT_PROB = 0.1
    BATCH = 8

    root = jax.random.PRNGKey(0)
    kx, kp, kd = jax.random.split(root, 3)
    x = jax.random.normal(kx, (BATCH, 3), dtype=jnp.float32)
    params, raw = make_params(kp, NO_OF_NEURONES)

    # --- training-mode forward (dropout on) --------------------------------
    y0, y1, y2 = triple_output_bnn(x, params, kd, DROPOUT_PROB)
    jax.block_until_ready((y0, y1, y2))

    assert y0.shape == (BATCH, OUT_FEATURES)
    assert y1.shape == (BATCH, OUT_FEATURES)
    assert y2.shape == (BATCH, OUT_FEATURES)
    assert y0.dtype == jnp.float32

    # Rebuild the exact same masks the jitted wrapper generated.
    ks, kh = jax.random.split(kd)
    scale = 1.0 / (1.0 - DROPOUT_PROB)
    mask_s = (jax.random.uniform(ks, (BATCH, NO_OF_NEURONES), dtype=jnp.float32)
              >= DROPOUT_PROB).astype(jnp.float32) * scale
    mask_h = (jax.random.uniform(kh, (NUM_HEADS, BATCH, NO_OF_NEURONES),
                                 dtype=jnp.float32)
              >= DROPOUT_PROB).astype(jnp.float32) * scale
    r0, r1, r2 = _reference(x, raw, mask_s, mask_h)
    for got, ref in ((y0, r0), (y1, r1), (y2, r2)):
        assert jnp.allclose(got, ref, rtol=1e-5, atol=1e-5), "mismatch vs reference"

    # --- inference-mode forward (dropout off -> mask-free kernel variant) ---
    z0, z1, z2 = triple_output_bnn(x, params, kd, 0.0)
    jax.block_until_ready((z0, z1, z2))
    ones_s = jnp.ones((BATCH, NO_OF_NEURONES), jnp.float32)
    ones_h = jnp.ones((NUM_HEADS, BATCH, NO_OF_NEURONES), jnp.float32)
    s0, s1, s2 = _reference(x, raw, ones_s, ones_h)
    for got, ref in ((z0, s0), (z1, s1), (z2, s2)):
        assert jnp.allclose(got, ref, rtol=1e-5, atol=1e-5), "mismatch vs reference (p=0)"

    print("KERNEL_OK")
</pallas_src>

<mosaic_0001>
module attributes {stable_mosaic.version = 11 : i64} {
  func.func @_triple_bnn_kernel(%arg0: memref<8x3xf32, #tpu.memory_space<vmem>>, %arg1: memref<3x32xf32, #tpu.memory_space<vmem>>, %arg2: memref<1x32xf32, #tpu.memory_space<vmem>>, %arg3: memref<3x32x32xf32, #tpu.memory_space<vmem>>, %arg4: memref<3x1x32xf32, #tpu.memory_space<vmem>>, %arg5: memref<3x32x128xf32, #tpu.memory_space<vmem>>, %arg6: memref<3x1x128xf32, #tpu.memory_space<vmem>>, %arg7: memref<8x32xf32, #tpu.memory_space<vmem>>, %arg8: memref<3x8x32xf32, #tpu.memory_space<vmem>>, %arg9: memref<8x384xf32, #tpu.memory_space<vmem>>) attributes {dimension_semantics = [], scalar_prefetch = 0 : i64, scratch_operands = 0 : i64, tpu.core_type = #tpu.core_type<tc>} {
    %c0 = arith.constant 0 : index
    %c0_0 = arith.constant 0 : index
    %0 = vector.load %arg0[%c0, %c0_0] : memref<8x3xf32, #tpu.memory_space<vmem>>, vector<8x3xf32>
    %c0_1 = arith.constant 0 : index
    %c0_2 = arith.constant 0 : index
    %1 = vector.load %arg1[%c0_1, %c0_2] : memref<3x32xf32, #tpu.memory_space<vmem>>, vector<3x32xf32>
    %2 = vector.extract_strided_slice %0 {offsets = [0, 0], sizes = [8, 1], strides = [1, 1]} : vector<8x3xf32> to vector<8x1xf32>
    %3 = vector.extract_strided_slice %1 {offsets = [0, 0], sizes = [1, 32], strides = [1, 1]} : vector<3x32xf32> to vector<1x32xf32>
    %4 = vector.broadcast %2 : vector<8x1xf32> to vector<8x32xf32>
    %5 = vector.broadcast %3 : vector<1x32xf32> to vector<8x32xf32>
    %6 = arith.mulf %4, %5 : vector<8x32xf32>
    %7 = vector.extract_strided_slice %0 {offsets = [0, 1], sizes = [8, 1], strides = [1, 1]} : vector<8x3xf32> to vector<8x1xf32>
    %8 = vector.extract_strided_slice %1 {offsets = [1, 0], sizes = [1, 32], strides = [1, 1]} : vector<3x32xf32> to vector<1x32xf32>
    %9 = vector.broadcast %7 : vector<8x1xf32> to vector<8x32xf32>
    %10 = vector.broadcast %8 : vector<1x32xf32> to vector<8x32xf32>
    %11 = arith.mulf %9, %10 : vector<8x32xf32>
    %12 = arith.addf %6, %11 : vector<8x32xf32>
    %13 = vector.extract_strided_slice %0 {offsets = [0, 2], sizes = [8, 1], strides = [1, 1]} : vector<8x3xf32> to vector<8x1xf32>
    %14 = vector.extract_strided_slice %1 {offsets = [2, 0], sizes = [1, 32], strides = [1, 1]} : vector<3x32xf32> to vector<1x32xf32>
    %15 = vector.broadcast %13 : vector<8x1xf32> to vector<8x32xf32>
    %16 = vector.broadcast %14 : vector<1x32xf32> to vector<8x32xf32>
    %17 = arith.mulf %15, %16 : vector<8x32xf32>
    %18 = arith.addf %12, %17 : vector<8x32xf32>
    %c0_3 = arith.constant 0 : index
    %c0_4 = arith.constant 0 : index
    %19 = vector.load %arg2[%c0_3, %c0_4] : memref<1x32xf32, #tpu.memory_space<vmem>>, vector<1x32xf32>
    %20 = vector.broadcast %19 : vector<1x32xf32> to vector<8x32xf32>
    %21 = arith.addf %18, %20 : vector<8x32xf32>
    %cst = arith.constant 0.000000e+00 : f32
    %22 = vector.broadcast %cst : f32 to vector<8x32xf32>
    %23 = arith.maximumf %21, %22 : vector<8x32xf32>
    %c0_5 = arith.constant 0 : index
    %c0_6 = arith.constant 0 : index
    %24 = vector.load %arg7[%c0_5, %c0_6] : memref<8x32xf32, #tpu.memory_space<vmem>>, vector<8x32xf32>
    %25 = arith.mulf %23, %24 : vector<8x32xf32>
    %c0_7 = arith.constant 0 : index
    %c0_8 = arith.constant 0 : index
    %c0_9 = arith.constant 0 : index
    %26 = vector.load %arg3[%c0_7, %c0_8, %c0_9] : memref<3x32x32xf32, #tpu.memory_space<vmem>>, vector<1x32x32xf32>
    %27 = vector.shape_cast %26 : vector<1x32x32xf32> to vector<32x32xf32>
    %cst_10 = arith.constant dense<0.000000e+00> : vector<8x32xf32>
    %28 = tpu.matmul %25, %27, %cst_10 {dimension_numbers = #tpu.dot_dimension_numbers<[1], [0], [0], [1], [0, 0, 1, 1], [], []>} : vector<8x32xf32>, vector<32x32xf32>, vector<8x32xf32> -> vector<8x32xf32>
    %c0_11 = arith.constant 0 : index
    %c0_12 = arith.constant 0 : index
    %c0_13 = arith.constant 0 : index
    %29 = vector.load %arg4[%c0_11, %c0_12, %c0_13] : memref<3x1x32xf32, #tpu.memory_space<vmem>>, vector<1x1x32xf32>
    %30 = vector.shape_cast %29 : vector<1x1x32xf32> to vector<1x32xf32>
    %31 = vector.broadcast %30 : vector<1x32xf32> to vector<8x32xf32>
    %32 = arith.addf %28, %31 : vector<8x32xf32>
    %cst_14 = arith.constant 0.000000e+00 : f32
    %33 = vector.broadcast %cst_14 : f32 to vector<8x32xf32>
    %34 = arith.maximumf %32, %33 : vector<8x32xf32>
    %c0_15 = arith.constant 0 : index
    %c0_16 = arith.constant 0 : index
    %c0_17 = arith.constant 0 : index
    %35 = vector.load %arg8[%c0_15, %c0_16, %c0_17] : memref<3x8x32xf32, #tpu.memory_space<vmem>>, vector<1x8x32xf32>
    %36 = vector.shape_cast %35 : vector<1x8x32xf32> to vector<8x32xf32>
    %37 = arith.mulf %34, %36 : vector<8x32xf32>
    %c0_18 = arith.constant 0 : index
    %c0_19 = arith.constant 0 : index
    %c0_20 = arith.constant 0 : index
    %38 = vector.load %arg5[%c0_18, %c0_19, %c0_20] : memref<3x32x128xf32, #tpu.memory_space<vmem>>, vector<1x32x128xf32>
    %39 = vector.shape_cast %38 : vector<1x32x128xf32> to vector<32x128xf32>
    %cst_21 = arith.constant dense<0.000000e+00> : vector<8x128xf32>
    %40 = tpu.matmul %37, %39, %cst_21 {dimension_numbers = #tpu.dot_dimension_numbers<[1], [0], [0], [1], [0, 0, 1, 1], [], []>} : vector<8x32xf32>, vector<32x128xf32>, vector<8x128xf32> -> vector<8x128xf32>
    %c0_22 = arith.constant 0 : index
    %c0_23 = arith.constant 0 : index
    %c0_24 = arith.constant 0 : index
    %41 = vector.load %arg6[%c0_22, %c0_23, %c0_24] : memref<3x1x128xf32, #tpu.memory_space<vmem>>, vector<1x1x128xf32>
    %42 = vector.shape_cast %41 : vector<1x1x128xf32> to vector<1x128xf32>
    %43 = vector.broadcast %42 : vector<1x128xf32> to vector<8x128xf32>
    %44 = arith.addf %40, %43 : vector<8x128xf32>
    %c0_25 = arith.constant 0 : index
    %c0_26 = arith.constant 0 : index
    %45 = vector.load %arg9[%c0_25, %c0_26] : memref<8x384xf32, #tpu.memory_space<vmem>>, vector<8x128xf32>
    tpu.vector_store %arg9[%c0_25, %c0_26], %44 {strides = array<i32>} : memref<8x384xf32, #tpu.memory_space<vmem>>, vector<8x128xf32>,
    %c1 = arith.constant 1 : index
    %c0_27 = arith.constant 0 : index
    %c0_28 = arith.constant 0 : index
    %46 = vector.load %arg3[%c1, %c0_27, %c0_28] : memref<3x32x32xf32, #tpu.memory_space<vmem>>, vector<1x32x32xf32>
    %47 = vector.shape_cast %46 : vector<1x32x32xf32> to vector<32x32xf32>
    %cst_29 = arith.constant dense<0.000000e+00> : vector<8x32xf32>
    %48 = tpu.matmul %25, %47, %cst_29 {dimension_numbers = #tpu.dot_dimension_numbers<[1], [0], [0], [1], [0, 0, 1, 1], [], []>} : vector<8x32xf32>, vector<32x32xf32>, vector<8x32xf32> -> vector<8x32xf32>
    %c1_30 = arith.constant 1 : index
    %c0_31 = arith.constant 0 : index
    %c0_32 = arith.constant 0 : index
    %49 = vector.load %arg4[%c1_30, %c0_31, %c0_32] : memref<3x1x32xf32, #tpu.memory_space<vmem>>, vector<1x1x32xf32>
    %50 = vector.shape_cast %49 : vector<1x1x32xf32> to vector<1x32xf32>
    %51 = vector.broadcast %50 : vector<1x32xf32> to vector<8x32xf32>
    %52 = arith.addf %48, %51 : vector<8x32xf32>
    %cst_33 = arith.constant 0.000000e+00 : f32
    %53 = vector.broadcast %cst_33 : f32 to vector<8x32xf32>
    %54 = arith.maximumf %52, %53 : vector<8x32xf32>
    %c1_34 = arith.constant 1 : index
    %c0_35 = arith.constant 0 : index
    %c0_36 = arith.constant 0 : index
    %55 = vector.load %arg8[%c1_34, %c0_35, %c0_36] : memref<3x8x32xf32, #tpu.memory_space<vmem>>, vector<1x8x32xf32>
    %56 = vector.shape_cast %55 : vector<1x8x32xf32> to vector<8x32xf32>
    %57 = arith.mulf %54, %56 : vector<8x32xf32>
    %c1_37 = arith.constant 1 : index
    %c0_38 = arith.constant 0 : index
    %c0_39 = arith.constant 0 : index
    %58 = vector.load %arg5[%c1_37, %c0_38, %c0_39] : memref<3x32x128xf32, #tpu.memory_space<vmem>>, vector<1x32x128xf32>
    %59 = vector.shape_cast %58 : vector<1x32x128xf32> to vector<32x128xf32>
    %cst_40 = arith.constant dense<0.000000e+00> : vector<8x128xf32>
    %60 = tpu.matmul %57, %59, %cst_40 {dimension_numbers = #tpu.dot_dimension_numbers<[1], [0], [0], [1], [0, 0, 1, 1], [], []>} : vector<8x32xf32>, vector<32x128xf32>, vector<8x128xf32> -> vector<8x128xf32>
    %c1_41 = arith.constant 1 : index
    %c0_42 = arith.constant 0 : index
    %c0_43 = arith.constant 0 : index
    %61 = vector.load %arg6[%c1_41, %c0_42, %c0_43] : memref<3x1x128xf32, #tpu.memory_space<vmem>>, vector<1x1x128xf32>
    %62 = vector.shape_cast %61 : vector<1x1x128xf32> to vector<1x128xf32>
    %63 = vector.broadcast %62 : vector<1x128xf32> to vector<8x128xf32>
    %64 = arith.addf %60, %63 : vector<8x128xf32>
    %c0_44 = arith.constant 0 : index
    %c128 = arith.constant 128 : index
    %65 = vector.load %arg9[%c0_44, %c128] : memref<8x384xf32, #tpu.memory_space<vmem>>, vector<8x128xf32>
    tpu.vector_store %arg9[%c0_44, %c128], %64 {strides = array<i32>} : memref<8x384xf32, #tpu.memory_space<vmem>>, vector<8x128xf32>,
    %c2 = arith.constant 2 : index
    %c0_45 = arith.constant 0 : index
    %c0_46 = arith.constant 0 : index
    %66 = vector.load %arg3[%c2, %c0_45, %c0_46] : memref<3x32x32xf32, #tpu.memory_space<vmem>>, vector<1x32x32xf32>
    %67 = vector.shape_cast %66 : vector<1x32x32xf32> to vector<32x32xf32>
    %cst_47 = arith.constant dense<0.000000e+00> : vector<8x32xf32>
    %68 = tpu.matmul %25, %67, %cst_47 {dimension_numbers = #tpu.dot_dimension_numbers<[1], [0], [0], [1], [0, 0, 1, 1], [], []>} : vector<8x32xf32>, vector<32x32xf32>, vector<8x32xf32> -> vector<8x32xf32>
    %c2_48 = arith.constant 2 : index
    %c0_49 = arith.constant 0 : index
    %c0_50 = arith.constant 0 : index
    %69 = vector.load %arg4[%c2_48, %c0_49, %c0_50] : memref<3x1x32xf32, #tpu.memory_space<vmem>>, vector<1x1x32xf32>
    %70 = vector.shape_cast %69 : vector<1x1x32xf32> to vector<1x32xf32>
    %71 = vector.broadcast %70 : vector<1x32xf32> to vector<8x32xf32>
    %72 = arith.addf %68, %71 : vector<8x32xf32>
    %cst_51 = arith.constant 0.000000e+00 : f32
    %73 = vector.broadcast %cst_51 : f32 to vector<8x32xf32>
    %74 = arith.maximumf %72, %73 : vector<8x32xf32>
    %c2_52 = arith.constant 2 : index
    %c0_53 = arith.constant 0 : index
    %c0_54 = arith.constant 0 : index
    %75 = vector.load %arg8[%c2_52, %c0_53, %c0_54] : memref<3x8x32xf32, #tpu.memory_space<vmem>>, vector<1x8x32xf32>
    %76 = vector.shape_cast %75 : vector<1x8x32xf32> to vector<8x32xf32>
    %77 = arith.mulf %74, %76 : vector<8x32xf32>
    %c2_55 = arith.constant 2 : index
    %c0_56 = arith.constant 0 : index
    %c0_57 = arith.constant 0 : index
    %78 = vector.load %arg5[%c2_55, %c0_56, %c0_57] : memref<3x32x128xf32, #tpu.memory_space<vmem>>, vector<1x32x128xf32>
    %79 = vector.shape_cast %78 : vector<1x32x128xf32> to vector<32x128xf32>
    %cst_58 = arith.constant dense<0.000000e+00> : vector<8x128xf32>
    %80 = tpu.matmul %77, %79, %cst_58 {dimension_numbers = #tpu.dot_dimension_numbers<[1], [0], [0], [1], [0, 0, 1, 1], [], []>} : vector<8x32xf32>, vector<32x128xf32>, vector<8x128xf32> -> vector<8x128xf32>
    %c2_59 = arith.constant 2 : index
    %c0_60 = arith.constant 0 : index
    %c0_61 = arith.constant 0 : index
    %81 = vector.load %arg6[%c2_59, %c0_60, %c0_61] : memref<3x1x128xf32, #tpu.memory_space<vmem>>, vector<1x1x128xf32>
    %82 = vector.shape_cast %81 : vector<1x1x128xf32> to vector<1x128xf32>
    %83 = vector.broadcast %82 : vector<1x128xf32> to vector<8x128xf32>
    %84 = arith.addf %80, %83 : vector<8x128xf32>
    %c0_62 = arith.constant 0 : index
    %c256 = arith.constant 256 : index
    %85 = vector.load %arg9[%c0_62, %c256] : memref<8x384xf32, #tpu.memory_space<vmem>>, vector<8x128xf32>
    tpu.vector_store %arg9[%c0_62, %c256], %84 {strides = array<i32>} : memref<8x384xf32, #tpu.memory_space<vmem>>, vector<8x128xf32>,
    return
  }
}

</mosaic_0001>

<bundles_post_ra>
// kernel: triple_output_bnn.3
= control target key start
LH: loop header
LB: loop body
LE: loop exit
PB: predicated region body
PF: predicated region fallthrough
CT: control target
= control target key end

     0   :  { %14 = vsyncpa [#allocation3], 0  ;;  %s350_s12 = smov [#allocation2]   ;;  %s351_s14 = smov 128   ;;  %s499_s0 = inlined_call_operand.vmem [shape: f32[8,3], index: 0, kind: input, shape index: {}]   ;;  %s500_s1 = inlined_call_operand.vmem [shape: f32[3,32], index: 1, kind: input, shape index: {}]   ;;  %s501_s2 = inlined_call_operand.vmem [shape: f32[1,32], index: 2, kind: input, shape index: {}]   ;;  %s502_s3 = inlined_call_operand.vmem [shape: f32[3,32,32], index: 3, kind: input, shape index: {}]   ;;  %s503_s4 = inlined_call_operand.vmem [shape: f32[3,1,32], index: 4, kind: input, shape index: {}]   ;;  %s504_s5 = inlined_call_operand.hbm [shape: f32[3,32,128], index: 5, kind: input, shape index: {}]   ;;  %s505_s6 = inlined_call_operand.vmem [shape: f32[3,1,128], index: 6, kind: input, shape index: {}]   ;;  %s506_s7 = inlined_call_operand.vmem [shape: f32[8,32], index: 7, kind: input, shape index: {}]   ;;  %s507_s8 = inlined_call_operand.vmem [shape: f32[3,8,32], index: 8, kind: input, shape index: {}]   ;;  %s508_s9 = inlined_call_operand.vmem [shape: f32[8,384], index: 9, kind: output, shape index: {}]  }
   0x1   :  { %s29_s11 = sshll.u32 %s504_s5, 4  ;;  %s31_s13 = sshll.u32 %s350_s12, 4  ;;  %s30_s11 = int_to_ptr.hbm [resolvable:$true] %s29_s11  ;;  %s32_s13 = int_to_ptr.vmem [resolvable:$true] %s31_s13 }
   0x2   :  { %s352_s15 = smov 8  }
   0x3   :  { %37 = dma.hbm_to_vmem [thread:$0]  %s30_s11, 1536, %s32_s13, [#allocation3], %s351_s14, %s351_s14, %s352_s15  }
   0x4   :  { %348 = dma.done.wait [#allocation3], 1536  }
   0x5   :  { %349 = vsyncadd [#allocation3], 4294965760  ;;  %v353_v0 = vmov 0   ;;  %v354_v1 = vmov 2   ;;  %v48_v2 = vld [vmem:[%s499_s0] sm:$0xff]  ;;  %v355_v3 = vmov 1  }
   0x6   :  { %313 = vset.pattern.permute.xlu0 %v353_v0  ;;  %315 = vset.pattern.permute.xlu1 %v354_v1  ;;  %v82_v4 = vld [vmem:[%s502_s3 + $0x18] sm:$0xff]  ;;  %v81_v6 = vld [vmem:[%s502_s3 + $0x10] sm:$0xff]  ;;  %v80_v8 = vld [vmem:[%s502_s3 + $0x8] sm:$0xff]  ;;  %vm87_vm0 = vcmask 261120  }
   0x7   :  { %52 = vperm.xlu0 %313, %v48_v2   ;;  %65 = vperm.xlu1 %315, %v48_v2   ;;  %v292_v5 = vld [vmem:[%s502_s3 + $0x38] sm:$0xff]  ;;  %v291_v7 = vld [vmem:[%s502_s3 + $0x30] sm:$0xff]  ;;  %v290_v9 = vld [vmem:[%s502_s3 + $0x28] sm:$0xff] }
   0x8   :  { %103 = vmatpush.msra.mxu0 %v82_v4  ;;  %168 = vmatpush.msra.mxu2 %v292_v5  ;;  %v79_v10 = vld [vmem:[%s502_s3] sm:$0xff]  ;;  %v301_v12 = vld [vmem:[%s502_s3 + $0x58] sm:$0xff]  ;;  %v300_v13 = vld [vmem:[%s502_s3 + $0x50] sm:$0xff] }
   0x9   :  { %v289_v11 = vld [vmem:[%s502_s3 + $0x20] sm:$0xff]  ;;  %v299_v14 = vld [vmem:[%s502_s3 + $0x48] sm:$0xff]  ;;  %v117_v33 = vld [vmem:[#allocation2 + $0x18] sm:$0xff] }
   0xa   :  { %104 = vmatpush.msra.mxu0 %v81_v6  ;;  %169 = vmatpush.msra.mxu2 %v291_v7  ;;  %v298_v15 = vld [vmem:[%s502_s3 + $0x40] sm:$0xff]  ;;  %v116_v34 = vld [vmem:[#allocation2 + $0x10] sm:$0xff]  ;;  %v115_v35 = vld [vmem:[#allocation2 + $0x8] sm:$0xff] }
   0xb   :  { %v49_v17 = vld [vmem:[%s500_s1] sm:$0x7]  ;;  %137 = vmatpush.msra.mxu1 %v117_v33  ;;  %v184_v37 = vld [vmem:[#allocation2 + $0x38] sm:$0xff]  ;;  %v183_v38 = vld [vmem:[#allocation2 + $0x30] sm:$0xff] }
   0xc   :  { %105 = vmatpush.msra.mxu0 %v80_v8  ;;  %170 = vmatpush.msra.mxu2 %v290_v9  ;;  %v55_v18 = vperm.slane %v49_v17, 0  ;;  %v61_v19 = vperm.slane %v49_v17, 1  ;;  %v68_v20 = vperm.slane %v49_v17, 2  ;;  %v317_v27 = vld [vmem:[%s501_s2] ss:$0 sm:$0xff]  ;;  %v252_v39 = vld [vmem:[#allocation2 + $0x58] sm:$0xff] }
   0xd   :  { %v77_v30 = vld [vmem:[%s506_s7] sm:$0xff]  ;;  %138 = vmatpush.msra.mxu1 %v116_v34  ;;  %205 = vmatpush.msra.mxu3 %v184_v37  ;;  %v182_v40 = vld [vmem:[#allocation2 + $0x28] sm:$0xff]  ;;  %v251_v41 = vld [vmem:[#allocation2 + $0x50] sm:$0xff] }
   0xe   :  { %106 = vmatpush.msra.mxu0 %v79_v10  ;;  %171 = vmatpush.msra.mxu2 %v289_v11  ;;  %v114_v36 = vld [vmem:[#allocation2] sm:$0xff]  ;;  %v250_v43 = vld [vmem:[#allocation2 + $0x48] sm:$0xff]  ;;  %v304_v59 = vld [vmem:[%s507_s8 + $0x10] sm:$0xff] }
   0xf   :  { %314 = vset.pattern.permute.xlu0 %v355_v3  ;;  %139 = vmatpush.msra.mxu1 %v115_v35  ;;  %v181_v42 = vld [vmem:[#allocation2 + $0x20] sm:$0xff]  ;;  %v295_v55 = vld [vmem:[%s507_s8 + $0x8] sm:$0xff] }
  0x10   :  { %58 = vperm.xlu0 %314, %v48_v2   ;;  %236 = vmatpush.msrb.mxu0 %v301_v12  ;;  %v249_v44 = vld [vmem:[#allocation2 + $0x40] sm:$0xff] }
  0x11   :  { %140 = vmatpush.msra.mxu1 %v114_v36  ;;  %206 = vmatpush.msra.mxu3 %v183_v38  ;;  %v318_v45 = vld [vmem:[%s503_s4] ss:$0 sm:$0xff]  ;;  %v319_v50 = vld [vmem:[%s503_s4 + $0x1] ss:$0 sm:$0xff]  ;;  %v320_v52 = vld [vmem:[%s503_s4 + $0x2] ss:$0 sm:$0xff] }
  0x12   :  { %237 = vmatpush.msrb.mxu0 %v300_v13  ;;  %v112_v48 = vld [vmem:[%s507_s8] sm:$0xff] }
  0x13   :  { %273 = vmatpush.msrb.mxu1 %v252_v39  ;;  %207 = vmatpush.msra.mxu3 %v182_v40  ;;  %v321_v63 = vld [vmem:[%s505_s6] ss:$0 sm:$0xff]  ;;  %v322_v2 = vld [vmem:[%s505_s6 + $0x2] ss:$0 sm:$0xff]  ;;  %v323_v5 = vld [vmem:[%s505_s6 + $0x1] ss:$0 sm:$0xff] }
  0x14   :  { %238 = vmatpush.msrb.mxu0 %v299_v14 }
  0x15   :  { %274 = vmatpush.msrb.mxu1 %v251_v41  ;;  %208 = vmatpush.msra.mxu3 %v181_v42 }
  0x16   :  { %239 = vmatpush.msrb.mxu0 %v298_v15 }
  0x17   :  { %275 = vmatpush.msrb.mxu1 %v250_v43 }
  0x18   :  { %316 = vset.pattern.permute.xlu0 %v354_v1 }
  0x19   :  { %276 = vmatpush.msrb.mxu1 %v249_v44 }
  0x79   :  { %v53_v16 = vpop.permute.xlu0 %52  ;;  %v66_v21 = vpop.permute.xlu1 %65 }
  0x7a   :  { %v56_v23 = vmul.f32 %v55_v18, %v53_v16  ;;  %v69_v25 = vmul.f32 %v68_v20, %v66_v21 }
  0x82   :  { %v59_v22 = vpop.permute.xlu0 %58 }
  0x83   :  { %v62_v24 = vmul.f32 %v61_v19, %v59_v22 }
  0x85   :  { %v63_v26 = vadd.f32 %v62_v24, %v56_v23 }
  0x87   :  { %v70_v28 = vadd.f32 %v69_v25, %v63_v26 }
  0x89   :  { %v75_v29 = vadd.f32 %v317_v27, %v70_v28 }
  0x8b   :  { %v76_v31 = vmax.f32 %v75_v29, 0.0 }
  0x8d   :  { %v78_v32 = vmul.f32 %v77_v30, %v76_v31 }
  0x8f   :  { %287 = vmatmul.msk.f32.vlgmr.msra.gmra.mxu0 %vm87_vm0, %v78_v32  ;;  %294 = vmatmul.msk.f32.vlgmr.msra.gmra.mxu2 %vm87_vm0, %v78_v32 }
  0x97   :  { %303 = vmatmul.msk.f32.vlgmr.msrb.gmra.mxu0 %vm87_vm0, %v78_v32 }
 0x10c   :  { %v108_v46 = vpop.f32.mrf.mxu0 }
 0x10d   :  { %v109_v47 = vadd.f32 %v318_v45, %v108_v46 }
 0x10f   :  { %v111_v49 = vmax.f32 %v109_v47, 0.0 }
 0x111   :  { %v113_v51 = vmul.f32 %v112_v48, %v111_v49 }
 0x112   :  { %v173_v53 = vpop.f32.mrf.mxu2 }
 0x113   :  { %v174_v54 = vadd.f32 %v319_v50, %v173_v53  ;;  %288 = vmatmul.msk.f32.vlgmr.msra.gmra.mxu1 %vm87_vm0, %v113_v51 }
 0x114   :  { %v241_v56 = vpop.f32.mrf.mxu0 }
 0x115   :  { %v176_v57 = vmax.f32 %v174_v54, 0.0  ;;  %v242_v58 = vadd.f32 %v320_v52, %v241_v56 }
 0x117   :  { %v179_v60 = vmul.f32 %v295_v55, %v176_v57  ;;  %v244_v61 = vmax.f32 %v242_v58, 0.0 }
 0x119   :  { %v247_v62 = vmul.f32 %v304_v59, %v244_v61  ;;  %297 = vmatmul.msk.f32.vlgmr.msra.gmra.mxu3 %vm87_vm0, %v179_v60 }
 0x11b   :  { %306 = vmatmul.msk.f32.vlgmr.msrb.gmra.mxu1 %vm87_vm0, %v247_v62 }
 0x190   :  { %v142_v0 = vpop.f32.mrf.mxu1 }
 0x191   :  { %v143_v1 = vadd.f32 %v321_v63, %v142_v0 }
 0x193   :  { %145 = vst [vmem:[%s508_s9] sm:$0xff] %v143_v1 }
 0x198   :  { %v278_v3 = vpop.f32.mrf.mxu1 }
 0x199   :  { %v279_v4 = vadd.f32 %v322_v2, %v278_v3 }
 0x19b   :  { %281 = vst [vmem:[%s508_s9 + $0x10] sm:$0xff] %v279_v4 }
 0x19c   :  { %v210_v6 = vpop.f32.mrf.mxu3 }
 0x19d   :  { %v211_v7 = vadd.f32 %v323_v5, %v210_v6 }
 0x19f   :  { %213 = vst [vmem:[%s508_s9 + $0x8] sm:$0xff] %v211_v7 }
 0x1a0   :  { %286 = vsyncpa [#allocation3], 1 }

</bundles_post_ra>
